<compile_context>
chip_gen: v6e
topology: v6e:2x2x1
jax: 0.10.0
libtpu: 0.0.40
codegen_flags: <defaults>
</compile_context>

<pallas_src>
from functools import partial

import jax
import jax.numpy as jnp
from jax.experimental import pallas as pl
from jax.experimental.pallas import tpu as pltpu


def _elu_feature_map_kernel(x_ref, o_ref):
    x = x_ref[...]
    # Compute natively for f32 / bf16; upcast other float dtypes to f32.
    if x.dtype not in (jnp.float32, jnp.bfloat16):
        x = x.astype(jnp.float32)
    # elu(x) + 1 == x + 1   (x > 0)
    #            == exp(x)  (x <= 0)   [alpha = 1]
    y = jnp.where(x > 0, x + 1.0, jnp.exp(x))
    o_ref[...] = y.astype(o_ref.dtype)


@partial(jax.jit, static_argnames=("lane_width", "target_block_bytes"))
def _feature_map_forward_impl(x, lane_width, target_block_bytes):
    orig_shape = x.shape
    orig_dtype = x.dtype
    n = x.size

    itemsize = jnp.dtype(orig_dtype).itemsize
    sublane = 16 if itemsize == 2 else 8  # 16-bit dtypes pack 2 rows per sublane

    # Flatten to a lane-dense slab (rows, lane_width). Only the tail is padded
    # (at most sublane * lane_width extra elements).
    flat = x.reshape(-1)
    rows = pl.cdiv(n, lane_width)
    padded_rows = pl.cdiv(rows, sublane) * sublane
    padded_n = padded_rows * lane_width
    if padded_n != n:
        flat = jnp.pad(flat, (0, padded_n - n))
    x2 = flat.reshape(padded_rows, lane_width)

    # ~2 MiB blocks: big enough to amortize per-step overhead, small enough for
    # the default scoped VMEM on every TPU generation with 4 live buffers
    # (double-buffered input + output).
    block_rows = (target_block_bytes // (lane_width * itemsize)) // sublane * sublane
    block_rows = max(sublane, min(padded_rows, block_rows))
    grid = (pl.cdiv(padded_rows, block_rows),)

    out = pl.pallas_call(
        _elu_feature_map_kernel,
        out_shape=jax.ShapeDtypeStruct((padded_rows, lane_width), orig_dtype),
        grid=grid,
        in_specs=[pl.BlockSpec((block_rows, lane_width), lambda i: (i, 0))],
        out_specs=pl.BlockSpec((block_rows, lane_width), lambda i: (i, 0)),
        compiler_params=pltpu.CompilerParams(
            dimension_semantics=("parallel",),
        ),
    )(x2)

    out_flat = out.reshape(-1)
    if padded_n != n:
        out_flat = out_flat[:n]
    return out_flat.reshape(orig_shape)


def feature_map_forward(x, *, lane_width=512, target_block_bytes=2 * 1024 * 1024):
    """phi(x) = elu(x) + 1, computed in a Pallas TPU kernel.

    x: any shape / float dtype. Returns an array of the same shape and dtype.
    lane_width must be a multiple of 128 (lane-dense output slab).
    """
    if x.size == 0:
        return x
    assert lane_width % 128 == 0, "lane_width must be a multiple of 128"
    return _feature_map_forward_impl(x, lane_width, target_block_bytes)


class FeatureMapPallas:
    """JAX/Pallas counterpart of the PyTorch FeatureMap interface."""

    def __init__(self, query_dims):
        self.query_dims = query_dims

    def new_feature_map(self, device=None):
        # Deterministic (non-random) feature map: nothing to resample.
        pass

    def __call__(self, x):
        return feature_map_forward(x)

    def forward_queries(self, x):
        return self(x)

    def forward_keys(self, x):
        return self(x)

    @classmethod
    def factory(cls, *args, **kwargs):
        def inner(query_dims):
            return cls(query_dims, *args, **kwargs)
        return inner


if __name__ == "__main__":
    key = jax.random.PRNGKey(0)

    def ref_phi(x):
        xf = x.astype(jnp.float32)
        return jnp.where(xf > 0, xf + 1.0, jnp.exp(xf))

    # Test 1: canonical small (batch, seq, query_dims) f32 input.
    batch, seq, query_dims = 2, 8, 32
    x = jax.random.normal(key, (batch, seq, query_dims), dtype=jnp.float32)

    fmap = FeatureMapPallas.factory()(query_dims)
    fmap.new_feature_map()

    q_feat = fmap.forward_queries(x)
    k_feat = fmap.forward_keys(x)
    jax.block_until_ready((q_feat, k_feat))

    ref = ref_phi(x)
    assert q_feat.shape == x.shape and q_feat.dtype == x.dtype
    assert jnp.allclose(q_feat, ref, atol=1e-6, rtol=1e-6)
    assert jnp.allclose(k_feat, ref, atol=1e-6, rtol=1e-6)

    # Test 2: odd, non-power-of-two shape -> exercises tail padding path.
    x_odd = jax.random.normal(jax.random.PRNGKey(1), (4, 257, 64), dtype=jnp.float32)
    y_odd = feature_map_forward(x_odd)
    jax.block_until_ready(y_odd)
    assert y_odd.shape == x_odd.shape and y_odd.dtype == x_odd.dtype
    assert jnp.allclose(y_odd, ref_phi(x_odd), atol=1e-6, rtol=1e-6)

    # Test 3: bf16 path (computed natively in bf16 inside the kernel).
    x_bf16 = x.astype(jnp.bfloat16)
    y_bf16 = feature_map_forward(x_bf16)
    jax.block_until_ready(y_bf16)
    assert y_bf16.shape == x_bf16.shape and y_bf16.dtype == jnp.bfloat16
    assert jnp.allclose(y_bf16.astype(jnp.float32), ref_phi(x_bf16),
                        atol=1e-1, rtol=1e-1)

    print("KERNEL_OK")
</pallas_src>

<mosaic_0001>
module attributes {stable_mosaic.version = 11 : i64} {
  func.func @_elu_feature_map_kernel(%arg0: i32, %arg1: memref<8x512xf32, #tpu.memory_space<vmem>>, %arg2: memref<8x512xf32, #tpu.memory_space<vmem>>) attributes {dimension_semantics = [#tpu.dimension_semantics<parallel>], iteration_bounds = array<i64: 1>, scalar_prefetch = 0 : i64, scratch_operands = 0 : i64, tpu.core_type = #tpu.core_type<tc>, window_params = [{transform_indices = @transform_0, window_bounds = array<i64: 8, 512>}, {transform_indices = @transform_1, window_bounds = array<i64: 8, 512>}]} {
    %c0 = arith.constant 0 : index
    %c0_0 = arith.constant 0 : index
    %0 = vector.load %arg1[%c0, %c0_0] : memref<8x512xf32, #tpu.memory_space<vmem>>, vector<8x512xf32>
    %cst = arith.constant 0.000000e+00 : f32
    %1 = vector.broadcast %cst : f32 to vector<8x512xf32>
    %2 = arith.cmpf ogt, %0, %1 : vector<8x512xf32>
    %cst_1 = arith.constant 1.000000e+00 : f32
    %3 = vector.broadcast %cst_1 : f32 to vector<8x512xf32>
    %4 = arith.addf %0, %3 : vector<8x512xf32>
    %5 = math.exp %0 : vector<8x512xf32>
    %6 = arith.select %2, %4, %5 : vector<8x512xi1>, vector<8x512xf32>
    %c0_2 = arith.constant 0 : index
    %c0_3 = arith.constant 0 : index
    %7 = vector.load %arg2[%c0_2, %c0_3] : memref<8x512xf32, #tpu.memory_space<vmem>>, vector<8x512xf32>
    tpu.vector_store %arg2[%c0_2, %c0_3], %6 {strides = array<i32>} : memref<8x512xf32, #tpu.memory_space<vmem>>, vector<8x512xf32>,
    return
  }
  func.func @transform_0(%arg0: i32) -> (i32, i32) {
    %c0_i32 = arith.constant 0 : i32
    %c0_i32_0 = arith.constant 0 : i32
    return %arg0, %c0_i32 : i32, i32
  }
  func.func @transform_1(%arg0: i32) -> (i32, i32) {
    %c0_i32 = arith.constant 0 : i32
    %c0_i32_0 = arith.constant 0 : i32
    return %arg0, %c0_i32 : i32, i32
  }
}

</mosaic_0001>

<bundles_post_ra>
// kernel: _feature_map_forward_impl.1
= control target key start
LH: loop header
LB: loop body
LE: loop exit
PB: predicated region body
PF: predicated region fallthrough
CT: control target
= control target key end

     0   :  { %s82_s0 = inlined_call_operand.vmem [shape: f32[8,512], index: 0, kind: input, shape index: {}]   ;;  %s83_s1 = inlined_call_operand.vmem [shape: f32[8,512], index: 1, kind: output, shape index: {}]  }
   0x1   :  { %v8_v0 = vld [vmem:[%s82_s0] sm:$0xff]  ;;  %v9_v1 = vld [vmem:[%s82_s0 + $0x8] sm:$0xff]  ;;  %v10_v2 = vld [vmem:[%s82_s0 + $0x10] sm:$0xff] }
   0x2   :  { %v20_v3 = vmul.f32 1.442695, %v8_v0  ;;  %v11_v4 = vld [vmem:[%s82_s0 + $0x18] sm:$0xff]  ;;  %v22_v5 = vmul.f32 1.442695, %v9_v1  ;;  %v16_v8 = vadd.f32 1.0, %v8_v0 }
   0x3   :  { %v24_v6 = vmul.f32 1.442695, %v10_v2  ;;  %v26_v7 = vmul.f32 1.442695, %v11_v4  ;;  %vm12_vm0 = vcmp.gt.f32.partialorder %v8_v0, 0.0  ;;  %v17_v9 = vadd.f32 1.0, %v9_v1 }
   0x4   :  { %40 = vpow2.f32 %v20_v3  ;;  %vm13_vm1 = vcmp.gt.f32.partialorder %v9_v1, 0.0  ;;  %v18_v10 = vadd.f32 1.0, %v10_v2  ;;  %vm14_vm2 = vcmp.gt.f32.partialorder %v10_v2, 0.0 }
   0x5   :  { %42 = vpow2.f32 %v22_v5  ;;  %v19_v12 = vadd.f32 1.0, %v11_v4  ;;  %vm15_vm3 = vcmp.gt.f32.partialorder %v11_v4, 0.0 }
   0x6   :  { %44 = vpow2.f32 %v24_v6 }
   0x7   :  { %46 = vpow2.f32 %v26_v7 }
  0x11   :  { %v41_v11 = vpop.eup %40 }
  0x12   :  { %v43_v13 = vpop.eup %42  ;;  %v28_v14 = vsel %vm12_vm0, %v16_v8, %v41_v11 }
  0x13   :  { %v45_v15 = vpop.eup %44  ;;  %32 = vst [vmem:[%s83_s1] sm:$0xff] %v28_v14  ;;  %v29_v16 = vsel %vm13_vm1, %v17_v9, %v43_v13 }
  0x14   :  { %v47_v17 = vpop.eup %46  ;;  %33 = vst [vmem:[%s83_s1 + $0x8] sm:$0xff] %v29_v16  ;;  %v30_v18 = vsel %vm14_vm2, %v18_v10, %v45_v15 }
  0x15   :  { %34 = vst [vmem:[%s83_s1 + $0x10] sm:$0xff] %v30_v18  ;;  %v31_v19 = vsel %vm15_vm3, %v19_v12, %v47_v17 }
  0x16   :  { %35 = vst [vmem:[%s83_s1 + $0x18] sm:$0xff] %v31_v19 }

</bundles_post_ra>
